<compile_context>
chip_gen: v7x
topology: tpu7x:2x2x1
jax: 0.10.0
libtpu: 0.0.40
codegen_flags: <defaults>
</compile_context>

<pallas_src>
import functools

import jax
import jax.numpy as jnp
from jax.experimental import pallas as pl
from jax.experimental.pallas import tpu as pltpu


def _basic_block_kernel(x_ref, w1_ref, w2_ref, sb_ref, o_ref, mid_ref,
                        *, H, NB, WC, KH):
    """Fused BasicBlock forward for one block of NB images.

    x_ref  : (H+2, NB, W*C)   H-halo-padded input block (halo rows are zero)
    w1_ref : (KH, W*C, W*C)   conv1 weights, banded (dw taps + Cin contraction
                              + width 'same' padding folded) per dh
    w2_ref : (KH, W*C, W*C)   conv2 weights, same packing
    sb_ref : (4, W*C)         [scale1, bias1, scale2, bias2] (BN folded)
    o_ref  : (H, NB, W*C)     output block
    mid_ref: (H+2, NB, W*C)   VMEM scratch: H-halo-padded intermediate
    """
    M = H * NB

    # ---- stage 1: relu(bn1(conv1(x))) --------------------------------------
    # 3x3 conv == KH row-shifted (M, W*C) @ (W*C, W*C) matmuls.  Leading-axis
    # slices + reshapes are layout no-ops (minor dims are exactly one (8,128)
    # tile per row).
    acc = jnp.zeros((M, WC), jnp.float32)
    for dh in range(KH):
        lhs = x_ref[dh:dh + H].reshape(M, WC)
        acc = acc + jnp.dot(lhs, w1_ref[dh],
                            preferred_element_type=jnp.float32)
    out1 = jnp.maximum(acc * sb_ref[0:1, :] + sb_ref[1:2, :], 0.0)

    # Stage the intermediate into an H-halo-padded VMEM scratch for conv2.
    # Only the two halo rows are zeroed, every step: cheap (2 tiles) and safe
    # even when the parallel grid axis is split across TensorCores (no
    # "first iteration" assumption on per-core scratch state).
    mid_ref[0] = jnp.zeros((NB, WC), jnp.float32)
    mid_ref[H + 1] = jnp.zeros((NB, WC), jnp.float32)
    mid_ref[1:1 + H] = out1.reshape(H, NB, WC)

    # ---- stage 2: relu(bn2(conv2(out1)) + identity) ------------------------
    acc2 = jnp.zeros((M, WC), jnp.float32)
    for dh in range(KH):
        lhs = mid_ref[dh:dh + H].reshape(M, WC)
        acc2 = acc2 + jnp.dot(lhs, w2_ref[dh],
                              preferred_element_type=jnp.float32)
    identity = x_ref[1:1 + H].reshape(M, WC)       # residual, already in VMEM
    out2 = jnp.maximum(acc2 * sb_ref[2:3, :] + sb_ref[3:4, :] + identity, 0.0)
    o_ref[...] = out2.reshape(H, NB, WC)


def basic_block_forward_nhwc(x_nhwc, w1_rows, w2_rows, sb, *, n_blk=8):
    """x_nhwc: (N, H, W, C) float32; params pre-packed by `pack_params`."""
    N, H, W, C = x_nhwc.shape
    WC = W * C
    KH = w1_rows.shape[0]

    # Pad the batch to a multiple of n_blk (tail rows are zeros, sliced off
    # at the end, so no garbage is read or written into real outputs).
    pad_n = (-N) % n_blk
    if pad_n:
        x_nhwc = jnp.pad(x_nhwc, ((0, pad_n), (0, 0), (0, 0), (0, 0)))
    Np = N + pad_n
    nb = Np // n_blk

    # "Blocked NHWC" layout: (nb*(H+2), n_blk, W*C) with zero H-halo rows.
    # In a full ResNet this packing is chainable across blocks and paid once;
    # here it is a single fused pad+transpose on a tiny activation.
    x = x_nhwc.reshape(Np, H, WC)
    x = jnp.pad(x, ((0, 0), (1, 1), (0, 0)))
    x = x.reshape(nb, n_blk, H + 2, WC)
    x = jnp.transpose(x, (0, 2, 1, 3)).reshape(nb * (H + 2), n_blk, WC)

    kernel = functools.partial(_basic_block_kernel, H=H, NB=n_blk, WC=WC, KH=KH)

    out = pl.pallas_call(
        kernel,
        out_shape=jax.ShapeDtypeStruct((nb * H, n_blk, WC), jnp.float32),
        grid_spec=pltpu.PrefetchScalarGridSpec(
            num_scalar_prefetch=0,
            grid=(nb,),
            in_specs=[
                pl.BlockSpec((H + 2, n_blk, WC), lambda g: (g, 0, 0)),  # x
                pl.BlockSpec((KH, WC, WC), lambda g: (0, 0, 0)),        # conv1 w
                pl.BlockSpec((KH, WC, WC), lambda g: (0, 0, 0)),        # conv2 w
                pl.BlockSpec((4, WC), lambda g: (0, 0)),                # BN scale/bias
            ],
            out_specs=pl.BlockSpec((H, n_blk, WC), lambda g: (g, 0, 0)),
            scratch_shapes=[pltpu.VMEM((H + 2, n_blk, WC), jnp.float32)],
        ),
        compiler_params=pltpu.CompilerParams(
            dimension_semantics=("parallel",)),
    )(x, w1_rows, w2_rows, sb)

    out = out.reshape(nb, H, n_blk, WC)
    out = jnp.transpose(out, (0, 2, 1, 3)).reshape(Np, H, W, C)
    return out[:N]


def basic_block_forward(x_nchw, w1_rows, w2_rows, sb, *, n_blk=8):
    """PyTorch-layout entry point: (N, C, H, W) -> (N, C, H, W).

    The NCHW<->NHWC transposes live here (in the surrounding graph) so XLA
    can fuse them; the kernel itself works on the lane-dense NHWC layout.
    """
    x = jnp.transpose(x_nchw, (0, 2, 3, 1))
    out = basic_block_forward_nhwc(x, w1_rows, w2_rows, sb, n_blk=n_blk)
    return jnp.transpose(out, (0, 3, 1, 2))


# ----------------------------- parameter packing -----------------------------

def _fold_bn(gamma, beta, mean, var, eps=1e-5):
    scale = gamma / jnp.sqrt(var + eps)
    bias = beta - mean * scale
    return scale, bias


def _pack_conv_rows(w_oihw, W):
    """PyTorch (Cout, Cin, 3, 3) conv weights -> (3, W*Cin, W*Cout).

    rows[dh, w_in*Cin + ci, w_out*Cout + co] = w[co, ci, dh, w_in - w_out + 1]
    when |w_in - w_out| <= 1, else 0.  This folds the dw taps, the Cin
    contraction AND the width 'same' padding of one image row into a single
    aligned K = W*Cin banded matmul per dh (no width halo in the data).
    """
    Cout, Cin, KH, KW = w_oihw.shape
    w_hwio = jnp.transpose(w_oihw, (2, 3, 1, 0))           # (KH, KW, Cin, Cout)
    win = jnp.arange(W)[:, None, None]
    wout = jnp.arange(W)[None, :, None]
    dw = jnp.arange(KW)[None, None, :]
    sel = (win == wout + dw - (KW // 2)).astype(w_hwio.dtype)   # (W, W, KW)
    rows = jnp.einsum('pqd,hdio->hpiqo', sel, w_hwio)      # (KH, W, Cin, W, Cout)
    return rows.reshape(KH, W * Cin, W * Cout)


def pack_params(w1_oihw, bn1, w2_oihw, bn2, W):
    s1, b1 = _fold_bn(*bn1)
    s2, b2 = _fold_bn(*bn2)
    # Lane index is w*C + c, so per-channel vectors are tiled W times.
    sb = jnp.stack([jnp.tile(s1, W), jnp.tile(b1, W),
                    jnp.tile(s2, W), jnp.tile(b2, W)])     # (4, W*C)
    return _pack_conv_rows(w1_oihw, W), _pack_conv_rows(w2_oihw, W), sb


# ------------------------------- reference -----------------------------------

def _reference_forward(x_nchw, w1_oihw, bn1, w2_oihw, bn2):
    """Pure-JAX reference (lax conv) for correctness check."""
    x = jnp.transpose(x_nchw, (0, 2, 3, 1))
    s1, b1 = _fold_bn(*bn1)
    s2, b2 = _fold_bn(*bn2)

    def conv(inp, w_oihw):
        w = jnp.transpose(w_oihw, (2, 3, 1, 0))            # HWIO
        return jax.lax.conv_general_dilated(
            inp, w, window_strides=(1, 1), padding=((1, 1), (1, 1)),
            dimension_numbers=("NHWC", "HWIO", "NHWC"))

    out = jnp.maximum(conv(x, w1_oihw) * s1 + b1, 0.0)
    out = jnp.maximum(conv(out, w2_oihw) * s2 + b2 + x, 0.0)
    return jnp.transpose(out, (0, 3, 1, 2))


if __name__ == "__main__":
    # BasicBlock(inplanes=8, planes=8, stride=1, downsample=None, dim=2)
    # W * C = 128 -> fully lane-dense; N = 16 -> grid of 2 blocks of 8 images
    # (even grid length so v7x can shard across both TensorCores).
    N, C, H, W = 16, 8, 16, 16

    key = jax.random.PRNGKey(0)
    k_x, k_w1, k_w2, k_g1, k_g2, k_b1, k_b2 = jax.random.split(key, 7)

    x = jax.random.normal(k_x, (N, C, H, W), jnp.float32)

    # conv weights in PyTorch OIHW layout (bias=False in the module).
    w1_oihw = 0.1 * jax.random.normal(k_w1, (C, C, 3, 3), jnp.float32)
    w2_oihw = 0.1 * jax.random.normal(k_w2, (C, C, 3, 3), jnp.float32)

    # Eval-mode BatchNorm parameters / running stats (gamma, beta, mean, var).
    # TODO(synk): training-mode BatchNorm (batch statistics) is not implemented;
    # the kernel uses the module's inference behaviour with folded running stats.
    bn1 = (1.0 + 0.05 * jax.random.normal(k_g1, (C,), jnp.float32),
           0.1 * jax.random.normal(k_b1, (C,), jnp.float32),
           0.02 * jnp.arange(C, dtype=jnp.float32),
           1.0 + 0.1 * jnp.arange(C, dtype=jnp.float32))
    bn2 = (1.0 + 0.05 * jax.random.normal(k_g2, (C,), jnp.float32),
           0.1 * jax.random.normal(k_b2, (C,), jnp.float32),
           -0.01 * jnp.arange(C, dtype=jnp.float32),
           1.0 + 0.05 * jnp.arange(C, dtype=jnp.float32))

    w1_rows, w2_rows, sb = pack_params(w1_oihw, bn1, w2_oihw, bn2, W)

    out = jax.jit(basic_block_forward)(x, w1_rows, w2_rows, sb)
    out = jax.block_until_ready(out)

    ref = _reference_forward(x, w1_oihw, bn1, w2_oihw, bn2)
    assert out.shape == (N, C, H, W)
    err = float(jnp.max(jnp.abs(out - ref)))
    assert err < 5e-4, f"max abs error {err}"

    print("KERNEL_OK")
</pallas_src>

<mosaic_0001>
module attributes {stable_mosaic.version = 11 : i64} {
  func.func @_basic_block_kernel(%arg0: i32, %arg1: memref<18x8x128xf32, #tpu.memory_space<vmem>>, %arg2: memref<3x128x128xf32, #tpu.memory_space<vmem>>, %arg3: memref<3x128x128xf32, #tpu.memory_space<vmem>>, %arg4: memref<4x128xf32, #tpu.memory_space<vmem>>, %arg5: memref<16x8x128xf32, #tpu.memory_space<vmem>>, %arg6: memref<18x8x128xf32, #tpu.memory_space<vmem>>) attributes {dimension_semantics = [#tpu.dimension_semantics<parallel>], iteration_bounds = array<i64: 2>, scalar_prefetch = 0 : i64, scratch_operands = 1 : i64, tpu.core_type = #tpu.core_type<tc>, window_params = [{transform_indices = @transform_0, window_bounds = array<i64: 18, 8, 128>}, {pipeline_mode = #tpu.pipeline_mode<synchronous>, transform_indices = @transform_1, window_bounds = array<i64: 3, 128, 128>}, {pipeline_mode = #tpu.pipeline_mode<synchronous>, transform_indices = @transform_2, window_bounds = array<i64: 3, 128, 128>}, {pipeline_mode = #tpu.pipeline_mode<synchronous>, transform_indices = @transform_3, window_bounds = array<i64: 4, 128>}, {transform_indices = @transform_4, window_bounds = array<i64: 16, 8, 128>}]} {
    %cst = arith.constant 0.000000e+00 : f32
    %0 = vector.broadcast %cst : f32 to vector<128x128xf32>
    %c0 = arith.constant 0 : index
    %c0_0 = arith.constant 0 : index
    %c0_1 = arith.constant 0 : index
    %1 = vector.load %arg1[%c0, %c0_0, %c0_1] : memref<18x8x128xf32, #tpu.memory_space<vmem>>, vector<16x8x128xf32>
    %2 = vector.shape_cast %1 : vector<16x8x128xf32> to vector<128x128xf32>
    %c0_2 = arith.constant 0 : index
    %c0_3 = arith.constant 0 : index
    %c0_4 = arith.constant 0 : index
    %3 = vector.load %arg2[%c0_2, %c0_3, %c0_4] : memref<3x128x128xf32, #tpu.memory_space<vmem>>, vector<1x128x128xf32>
    %4 = vector.shape_cast %3 : vector<1x128x128xf32> to vector<128x128xf32>
    %cst_5 = arith.constant dense<0.000000e+00> : vector<128x128xf32>
    %5 = tpu.matmul %2, %4, %cst_5 {dimension_numbers = #tpu.dot_dimension_numbers<[1], [0], [0], [1], [0, 0, 1, 1], [], []>} : vector<128x128xf32>, vector<128x128xf32>, vector<128x128xf32> -> vector<128x128xf32>
    %6 = arith.addf %0, %5 : vector<128x128xf32>
    %c1 = arith.constant 1 : index
    %c0_6 = arith.constant 0 : index
    %c0_7 = arith.constant 0 : index
    %7 = vector.load %arg1[%c1, %c0_6, %c0_7] : memref<18x8x128xf32, #tpu.memory_space<vmem>>, vector<16x8x128xf32>
    %8 = vector.shape_cast %7 : vector<16x8x128xf32> to vector<128x128xf32>
    %c1_8 = arith.constant 1 : index
    %c0_9 = arith.constant 0 : index
    %c0_10 = arith.constant 0 : index
    %9 = vector.load %arg2[%c1_8, %c0_9, %c0_10] : memref<3x128x128xf32, #tpu.memory_space<vmem>>, vector<1x128x128xf32>
    %10 = vector.shape_cast %9 : vector<1x128x128xf32> to vector<128x128xf32>
    %cst_11 = arith.constant dense<0.000000e+00> : vector<128x128xf32>
    %11 = tpu.matmul %8, %10, %cst_11 {dimension_numbers = #tpu.dot_dimension_numbers<[1], [0], [0], [1], [0, 0, 1, 1], [], []>} : vector<128x128xf32>, vector<128x128xf32>, vector<128x128xf32> -> vector<128x128xf32>
    %12 = arith.addf %6, %11 : vector<128x128xf32>
    %c2 = arith.constant 2 : index
    %c0_12 = arith.constant 0 : index
    %c0_13 = arith.constant 0 : index
    %13 = vector.load %arg1[%c2, %c0_12, %c0_13] : memref<18x8x128xf32, #tpu.memory_space<vmem>>, vector<16x8x128xf32>
    %14 = vector.shape_cast %13 : vector<16x8x128xf32> to vector<128x128xf32>
    %c2_14 = arith.constant 2 : index
    %c0_15 = arith.constant 0 : index
    %c0_16 = arith.constant 0 : index
    %15 = vector.load %arg2[%c2_14, %c0_15, %c0_16] : memref<3x128x128xf32, #tpu.memory_space<vmem>>, vector<1x128x128xf32>
    %16 = vector.shape_cast %15 : vector<1x128x128xf32> to vector<128x128xf32>
    %cst_17 = arith.constant dense<0.000000e+00> : vector<128x128xf32>
    %17 = tpu.matmul %14, %16, %cst_17 {dimension_numbers = #tpu.dot_dimension_numbers<[1], [0], [0], [1], [0, 0, 1, 1], [], []>} : vector<128x128xf32>, vector<128x128xf32>, vector<128x128xf32> -> vector<128x128xf32>
    %18 = arith.addf %12, %17 : vector<128x128xf32>
    %c0_18 = arith.constant 0 : index
    %c0_19 = arith.constant 0 : index
    %19 = vector.load %arg4[%c0_18, %c0_19] : memref<4x128xf32, #tpu.memory_space<vmem>>, vector<1x128xf32>
    %20 = vector.broadcast %19 : vector<1x128xf32> to vector<128x128xf32>
    %21 = arith.mulf %18, %20 : vector<128x128xf32>
    %c1_20 = arith.constant 1 : index
    %c0_21 = arith.constant 0 : index
    %22 = vector.load %arg4[%c1_20, %c0_21] : memref<4x128xf32, #tpu.memory_space<vmem>>, vector<1x128xf32>
    %23 = vector.broadcast %22 : vector<1x128xf32> to vector<128x128xf32>
    %24 = arith.addf %21, %23 : vector<128x128xf32>
    %cst_22 = arith.constant 0.000000e+00 : f32
    %25 = vector.broadcast %cst_22 : f32 to vector<128x128xf32>
    %26 = arith.maximumf %24, %25 : vector<128x128xf32>
    %cst_23 = arith.constant 0.000000e+00 : f32
    %27 = vector.broadcast %cst_23 : f32 to vector<8x128xf32>
    %c0_24 = arith.constant 0 : index
    %c0_25 = arith.constant 0 : index
    %c0_26 = arith.constant 0 : index
    %28 = vector.load %arg6[%c0_24, %c0_25, %c0_26] : memref<18x8x128xf32, #tpu.memory_space<vmem>>, vector<1x8x128xf32>
    %29 = vector.shape_cast %28 : vector<1x8x128xf32> to vector<8x128xf32>
    %30 = vector.shape_cast %27 : vector<8x128xf32> to vector<1x8x128xf32>
    tpu.vector_store %arg6[%c0_24, %c0_25, %c0_26], %30 {strides = array<i32>} : memref<18x8x128xf32, #tpu.memory_space<vmem>>, vector<1x8x128xf32>,
    %cst_27 = arith.constant 0.000000e+00 : f32
    %31 = vector.broadcast %cst_27 : f32 to vector<8x128xf32>
    %c17 = arith.constant 17 : index
    %c0_28 = arith.constant 0 : index
    %c0_29 = arith.constant 0 : index
    %32 = vector.load %arg6[%c17, %c0_28, %c0_29] : memref<18x8x128xf32, #tpu.memory_space<vmem>>, vector<1x8x128xf32>
    %33 = vector.shape_cast %32 : vector<1x8x128xf32> to vector<8x128xf32>
    %34 = vector.shape_cast %31 : vector<8x128xf32> to vector<1x8x128xf32>
    tpu.vector_store %arg6[%c17, %c0_28, %c0_29], %34 {strides = array<i32>} : memref<18x8x128xf32, #tpu.memory_space<vmem>>, vector<1x8x128xf32>,
    %35 = vector.shape_cast %26 : vector<128x128xf32> to vector<16x8x128xf32>
    %c1_30 = arith.constant 1 : index
    %c0_31 = arith.constant 0 : index
    %c0_32 = arith.constant 0 : index
    %36 = vector.load %arg6[%c1_30, %c0_31, %c0_32] : memref<18x8x128xf32, #tpu.memory_space<vmem>>, vector<16x8x128xf32>
    tpu.vector_store %arg6[%c1_30, %c0_31, %c0_32], %35 {strides = array<i32>} : memref<18x8x128xf32, #tpu.memory_space<vmem>>, vector<16x8x128xf32>,
    %cst_33 = arith.constant 0.000000e+00 : f32
    %37 = vector.broadcast %cst_33 : f32 to vector<128x128xf32>
    %c0_34 = arith.constant 0 : index
    %c0_35 = arith.constant 0 : index
    %c0_36 = arith.constant 0 : index
    %38 = vector.load %arg6[%c0_34, %c0_35, %c0_36] : memref<18x8x128xf32, #tpu.memory_space<vmem>>, vector<16x8x128xf32>
    %39 = vector.shape_cast %38 : vector<16x8x128xf32> to vector<128x128xf32>
    %c0_37 = arith.constant 0 : index
    %c0_38 = arith.constant 0 : index
    %c0_39 = arith.constant 0 : index
    %40 = vector.load %arg3[%c0_37, %c0_38, %c0_39] : memref<3x128x128xf32, #tpu.memory_space<vmem>>, vector<1x128x128xf32>
    %41 = vector.shape_cast %40 : vector<1x128x128xf32> to vector<128x128xf32>
    %cst_40 = arith.constant dense<0.000000e+00> : vector<128x128xf32>
    %42 = tpu.matmul %39, %41, %cst_40 {dimension_numbers = #tpu.dot_dimension_numbers<[1], [0], [0], [1], [0, 0, 1, 1], [], []>} : vector<128x128xf32>, vector<128x128xf32>, vector<128x128xf32> -> vector<128x128xf32>
    %43 = arith.addf %37, %42 : vector<128x128xf32>
    %c1_41 = arith.constant 1 : index
    %c0_42 = arith.constant 0 : index
    %c0_43 = arith.constant 0 : index
    %44 = vector.load %arg6[%c1_41, %c0_42, %c0_43] : memref<18x8x128xf32, #tpu.memory_space<vmem>>, vector<16x8x128xf32>
    %45 = vector.shape_cast %44 : vector<16x8x128xf32> to vector<128x128xf32>
    %c1_44 = arith.constant 1 : index
    %c0_45 = arith.constant 0 : index
    %c0_46 = arith.constant 0 : index
    %46 = vector.load %arg3[%c1_44, %c0_45, %c0_46] : memref<3x128x128xf32, #tpu.memory_space<vmem>>, vector<1x128x128xf32>
    %47 = vector.shape_cast %46 : vector<1x128x128xf32> to vector<128x128xf32>
    %cst_47 = arith.constant dense<0.000000e+00> : vector<128x128xf32>
    %48 = tpu.matmul %45, %47, %cst_47 {dimension_numbers = #tpu.dot_dimension_numbers<[1], [0], [0], [1], [0, 0, 1, 1], [], []>} : vector<128x128xf32>, vector<128x128xf32>, vector<128x128xf32> -> vector<128x128xf32>
    %49 = arith.addf %43, %48 : vector<128x128xf32>
    %c2_48 = arith.constant 2 : index
    %c0_49 = arith.constant 0 : index
    %c0_50 = arith.constant 0 : index
    %50 = vector.load %arg6[%c2_48, %c0_49, %c0_50] : memref<18x8x128xf32, #tpu.memory_space<vmem>>, vector<16x8x128xf32>
    %51 = vector.shape_cast %50 : vector<16x8x128xf32> to vector<128x128xf32>
    %c2_51 = arith.constant 2 : index
    %c0_52 = arith.constant 0 : index
    %c0_53 = arith.constant 0 : index
    %52 = vector.load %arg3[%c2_51, %c0_52, %c0_53] : memref<3x128x128xf32, #tpu.memory_space<vmem>>, vector<1x128x128xf32>
    %53 = vector.shape_cast %52 : vector<1x128x128xf32> to vector<128x128xf32>
    %cst_54 = arith.constant dense<0.000000e+00> : vector<128x128xf32>
    %54 = tpu.matmul %51, %53, %cst_54 {dimension_numbers = #tpu.dot_dimension_numbers<[1], [0], [0], [1], [0, 0, 1, 1], [], []>} : vector<128x128xf32>, vector<128x128xf32>, vector<128x128xf32> -> vector<128x128xf32>
    %55 = arith.addf %49, %54 : vector<128x128xf32>
    %c1_55 = arith.constant 1 : index
    %c0_56 = arith.constant 0 : index
    %c0_57 = arith.constant 0 : index
    %56 = vector.load %arg1[%c1_55, %c0_56, %c0_57] : memref<18x8x128xf32, #tpu.memory_space<vmem>>, vector<16x8x128xf32>
    %57 = vector.shape_cast %56 : vector<16x8x128xf32> to vector<128x128xf32>
    %c2_58 = arith.constant 2 : index
    %c0_59 = arith.constant 0 : index
    %58 = vector.load %arg4[%c2_58, %c0_59] : memref<4x128xf32, #tpu.memory_space<vmem>>, vector<1x128xf32>
    %59 = vector.broadcast %58 : vector<1x128xf32> to vector<128x128xf32>
    %60 = arith.mulf %55, %59 : vector<128x128xf32>
    %c3 = arith.constant 3 : index
    %c0_60 = arith.constant 0 : index
    %61 = vector.load %arg4[%c3, %c0_60] : memref<4x128xf32, #tpu.memory_space<vmem>>, vector<1x128xf32>
    %62 = vector.broadcast %61 : vector<1x128xf32> to vector<128x128xf32>
    %63 = arith.addf %60, %62 : vector<128x128xf32>
    %64 = arith.addf %63, %57 : vector<128x128xf32>
    %cst_61 = arith.constant 0.000000e+00 : f32
    %65 = vector.broadcast %cst_61 : f32 to vector<128x128xf32>
    %66 = arith.maximumf %64, %65 : vector<128x128xf32>
    %67 = vector.shape_cast %66 : vector<128x128xf32> to vector<16x8x128xf32>
    %c0_62 = arith.constant 0 : index
    %c0_63 = arith.constant 0 : index
    %c0_64 = arith.constant 0 : index
    %68 = vector.load %arg5[%c0_62, %c0_63, %c0_64] : memref<16x8x128xf32, #tpu.memory_space<vmem>>, vector<16x8x128xf32>
    tpu.vector_store %arg5[%c0_62, %c0_63, %c0_64], %67 {strides = array<i32>} : memref<16x8x128xf32, #tpu.memory_space<vmem>>, vector<16x8x128xf32>,
    return
  }
  func.func @transform_0(%arg0: i32) -> (i32, i32, i32) {
    %c0_i32 = arith.constant 0 : i32
    %c0_i32_0 = arith.constant 0 : i32
    %c0_i32_1 = arith.constant 0 : i32
    return %arg0, %c0_i32, %c0_i32_0 : i32, i32, i32
  }
  func.func @transform_1(%arg0: i32) -> (i32, i32, i32) {
    %c0_i32 = arith.constant 0 : i32
    %c0_i32_0 = arith.constant 0 : i32
    %c0_i32_1 = arith.constant 0 : i32
    %c0_i32_2 = arith.constant 0 : i32
    return %c0_i32, %c0_i32_0, %c0_i32_1 : i32, i32, i32
  }
  func.func @transform_2(%arg0: i32) -> (i32, i32, i32) {
    %c0_i32 = arith.constant 0 : i32
    %c0_i32_0 = arith.constant 0 : i32
    %c0_i32_1 = arith.constant 0 : i32
    %c0_i32_2 = arith.constant 0 : i32
    return %c0_i32, %c0_i32_0, %c0_i32_1 : i32, i32, i32
  }
  func.func @transform_3(%arg0: i32) -> (i32, i32) {
    %c0_i32 = arith.constant 0 : i32
    %c0_i32_0 = arith.constant 0 : i32
    %c0_i32_1 = arith.constant 0 : i32
    return %c0_i32, %c0_i32_0 : i32, i32
  }
  func.func @transform_4(%arg0: i32) -> (i32, i32, i32) {
    %c0_i32 = arith.constant 0 : i32
    %c0_i32_0 = arith.constant 0 : i32
    %c0_i32_1 = arith.constant 0 : i32
    return %arg0, %c0_i32, %c0_i32_0 : i32, i32, i32
  }
}

</mosaic_0001>

<bundles_post_ra>
// kernel: basic_block_forward.1
= control target key start
LH: loop header
LB: loop body
LE: loop exit
PB: predicated region body
PF: predicated region fallthrough
CT: control target
= control target key end

     0   :  { %s2495_s15 = smov 0   ;;  %s3106_s0 = inlined_call_operand.vmem [shape: f32[36,8,128], index: 0, kind: input, shape index: {}]   ;;  %s3107_s1 = inlined_call_operand.vmem [shape: f32[3,128,128], index: 1, kind: input, shape index: {}]   ;;  %s3108_s2 = inlined_call_operand.vmem [shape: f32[3,128,128], index: 2, kind: input, shape index: {}]   ;;  %s3109_s3 = inlined_call_operand.vmem [shape: f32[4,128], index: 3, kind: input, shape index: {}]   ;;  %s3110_s4 = inlined_call_operand.vmem [shape: f32[32,8,128], index: 4, kind: output, shape index: {}]  }
   0x1 LB: > { %s1542_s16 = sadd.s32 4294967295, %s2467_s15   ;;  %p1546_p0 = scmp.ge.s32.totalorder %s2467_s15, 1  ;;  %s2467_s15 = sphi %s2495_s15, %s14_s15  }
   0x2   : > { %p163_p1 = scmp.lt.s32.totalorder %s2467_s15, 3 }
   0x4   : > { %p164_p2 = pnand %p1546_p0, %p163_p1 }
   0x5   : > { %v1566_v0 = vld [vmem:[%s3107_s1 + $0x80] sm:$0xff] (!%p164_p2)  ;;  %v1567_v1 = vld [vmem:[%s3107_s1 + $0x88] sm:$0xff] (!%p164_p2)  ;;  %v1568_v2 = vld [vmem:[%s3107_s1 + $0x90] sm:$0xff] (!%p164_p2)  ;;  %s189_s23 = smul.u32 (!%p164_p2), 18, %s1542_s16  ;;  %s1548_s30 = sshll.u32 (!%p164_p2), %s1542_s16, 4 }
   0x6   : > { %167 = sbr.rel (%p164_p2) target bundleno = 638 (0x27e), region = 36  ;;  %v2196_v3 = vpack.c.bf16 (!%p164_p2), %v1567_v1, %v1566_v0  ;;  %v1569_v4 = vld [vmem:[%s3107_s1 + $0x98] sm:$0xff] (!%p164_p2)  ;;  %v1570_v6 = vld [vmem:[%s3107_s1 + $0xa0] sm:$0xff] (!%p164_p2)  ;;  %v1571_v7 = vld [vmem:[%s3107_s1 + $0xa8] sm:$0xff] (!%p164_p2)  ;;  %p196_p4 = scmp.lt.s32.totalorder (!%p164_p2), %s1548_s30, 31 }
   0x7   : > { %v2200_v5 = vpack.c.bf16 (!%p164_p2), %v1569_v4, %v1568_v2  ;;  %p190_p3 = scmp.lt.s32.totalorder (!%p164_p2), %s189_s23, 35  ;;  %v2204_v8 = vpack.c.bf16 (!%p164_p2), %v1571_v7, %v1570_v6  ;;  %v1572_v9 = vld [vmem:[%s3107_s1 + $0xb0] sm:$0xff] (!%p164_p2)  ;;  %v1573_v10 = vld [vmem:[%s3107_s1 + $0xb8] sm:$0xff] (!%p164_p2)  ;;  %v1574_v13 = vld [vmem:[%s3107_s1 + $0xc0] sm:$0xff] (!%p164_p2) }
   0x8   : > { %2197 = vmatprep.subr.bf16.mxu0 (!%p164_p2), %v2196_v3  ;;  %v2208_v12 = vpack.c.bf16 (!%p164_p2), %v1573_v10, %v1572_v9  ;;  %v1575_v14 = vld [vmem:[%s3107_s1 + $0xc8] sm:$0xff] (!%p164_p2)  ;;  %v1576_v16 = vld [vmem:[%s3107_s1 + $0xd0] sm:$0xff] (!%p164_p2)  ;;  %v1577_v17 = vld [vmem:[%s3107_s1 + $0xd8] sm:$0xff] (!%p164_p2) }
   0x9   : > { %2199 = vmatpush3.bf16.msra.mxu0 (!%p164_p2), %v2196_v3  ;;  %v2212_v15 = vpack.c.bf16 (!%p164_p2), %v1575_v14, %v1574_v13  ;;  %v2216_v18 = vpack.c.bf16 (!%p164_p2), %v1577_v17, %v1576_v16  ;;  %v1578_v19 = vld [vmem:[%s3107_s1 + $0xe0] sm:$0xff] (!%p164_p2)  ;;  %v1579_v20 = vld [vmem:[%s3107_s1 + $0xe8] sm:$0xff] (!%p164_p2)  ;;  %v1580_v22 = vld [vmem:[%s3107_s1 + $0xf0] sm:$0xff] (!%p164_p2) }
   0xa   : > { %2201 = vmatprep.subr.bf16.mxu0 (!%p164_p2), %v2200_v5  ;;  %v2220_v21 = vpack.c.bf16 (!%p164_p2), %v1579_v20, %v1578_v19  ;;  %v1581_v23 = vld [vmem:[%s3107_s1 + $0xf8] sm:$0xff] (!%p164_p2)  ;;  %v1616_v24 = vld [vmem:[%s3108_s2 + $0x80] sm:$0xff] (!%p164_p2)  ;;  %v1617_v25 = vld [vmem:[%s3108_s2 + $0x88] sm:$0xff] (!%p164_p2) }
   0xb   : > { %v1618_v26 = vld [vmem:[%s3108_s2 + $0x90] sm:$0xff] (!%p164_p2)  ;;  %v2292_v27 = vpack.c.bf16 (!%p164_p2), %v1617_v25, %v1616_v24  ;;  %v1619_v28 = vld [vmem:[%s3108_s2 + $0x98] sm:$0xff] (!%p164_p2)  ;;  %v1620_v30 = vld [vmem:[%s3108_s2 + $0xa0] sm:$0xff] (!%p164_p2)  ;;  %v2224_v32 = vpack.c.bf16 (!%p164_p2), %v1581_v23, %v1580_v22 }
   0xc   : > { %v2296_v29 = vpack.c.bf16 (!%p164_p2), %v1619_v28, %v1618_v26  ;;  %v1621_v31 = vld [vmem:[%s3108_s2 + $0xa8] sm:$0xff] (!%p164_p2)  ;;  %v217_v33 = vld [vmem:[%s3107_s1] sm:$0xff] (!%p164_p2)  ;;  %v1622_v36 = vld [vmem:[%s3108_s2 + $0xb0] sm:$0xff] (!%p164_p2) }
   0xd   : > { %s3112_s23 = smov (!%p190_p3, %s189_s23), 35  ;;  %2203 = vmatpush3.bf16.msra.mxu0 %v2200_v5  ;;  %2293 = vmatprep.subr.bf16.mxu1 %v2292_v27  ;;  %v218_v34 = vld [vmem:[%s3107_s1 + $0x8] sm:$0xff]  ;;  %v2300_v35 = vpack.c.bf16 %v1621_v31, %v1620_v30  ;;  %v1623_v37 = vld [vmem:[%s3108_s2 + $0xb8] sm:$0xff]  ;;  %v219_v39 = vld [vmem:[%s3107_s1 + $0x10] sm:$0xff]  ;;  %s3114_s30 = smov (!%p196_p4, %s1548_s30), 31 }
   0xe   : > { %s1547_s8 = sshll.u32 %s3112_s23, 3  ;;  %2205 = vmatprep.subr.bf16.mxu0 %v2204_v8  ;;  %2295 = vmatpush3.bf16.msra.mxu1 %v2292_v27  ;;  %v2228_v38 = vpack.c.bf16 %v218_v34, %v217_v33  ;;  %v220_v40 = vld [vmem:[%s3107_s1 + $0x18] sm:$0xff]  ;;  %v2304_v41 = vpack.c.bf16 %v1623_v37, %v1622_v36  ;;  %v1624_v43 = vld [vmem:[%s3108_s2 + $0xc0] sm:$0xff]  ;;  %v1625_v44 = vld [vmem:[%s3108_s2 + $0xc8] sm:$0xff] }
   0xf   : > { %s2532_s11 = scalar_lea.vmem %s3106_s0, %s1547_s8  ;;  %2297 = vmatprep.subr.bf16.mxu1 %v2296_v29  ;;  %v2232_v46 = vpack.c.bf16 %v220_v40, %v219_v39  ;;  %v221_v47 = vld [vmem:[%s3107_s1 + $0x20] sm:$0xff]  ;;  %v222_v48 = vld [vmem:[%s3107_s1 + $0x28] sm:$0xff]  ;;  %v2308_v49 = vpack.c.bf16 %v1625_v44, %v1624_v43  ;;  %v1626_v51 = vld [vmem:[%s3108_s2 + $0xd0] sm:$0xff]  ;;  %s1549_s8 = sshll.u32 %s3114_s30, 3 }
  0x10   : > { %v2535_v11 = vld [vmem:[%s2532_s11 + $0x8] sm:$0xff]  ;;  %v2599_v42 = vld [vmem:[%s2532_s11 + $0x10] sm:$0xff]  ;;  %v2608_v45 = vld [vmem:[%s2532_s11 + $0x18] sm:$0xff]  ;;  %v2236_v54 = vpack.c.bf16 %v222_v48, %v221_v47  ;;  %s3043_s10 = scalar_lea.vmem %s3110_s4, %s1549_s8 }
  0x11   : > { %1892 = vmatprep.mubr.f32.mxu0 %v2535_v11  ;;  %2207 = vmatpush3.bf16.msra.mxu0 %v2204_v8  ;;  %v2619_v50 = vld [vmem:[%s2532_s11 + $0x20] sm:$0xff]  ;;  %v1627_v52 = vld [vmem:[%s3108_s2 + $0xd8] sm:$0xff]  ;;  %v2628_v53 = vld [vmem:[%s2532_s11 + $0x28] sm:$0xff] }
  0x12   : > { %2209 = vmatprep.subr.bf16.mxu0 %v2208_v12  ;;  %2299 = vmatpush3.bf16.msra.mxu1 %v2296_v29  ;;  %v223_v55 = vld [vmem:[%s3107_s1 + $0x30] sm:$0xff]  ;;  %v224_v56 = vld [vmem:[%s3107_s1 + $0x38] sm:$0xff]  ;;  %v2312_v57 = vpack.c.bf16 %v1627_v52, %v1626_v51  ;;  %v225_v61 = vld [vmem:[%s3107_s1 + $0x40] sm:$0xff] }
  0x13   : > { %2301 = vmatprep.subr.bf16.mxu1 %v2300_v35  ;;  %v2639_v58 = vld [vmem:[%s2532_s11 + $0x30] sm:$0xff]  ;;  %v2642_v59 = vld [vmem:[%s2532_s11 + $0x38] sm:$0xff]  ;;  %v2240_v60 = vpack.c.bf16 %v224_v56, %v223_v55  ;;  %v226_v62 = vld [vmem:[%s3107_s1 + $0x48] sm:$0xff] }
  0x14   : > { %v2653_v63 = vld [vmem:[%s2532_s11 + $0x40] sm:$0xff]  ;;  %v2656_v0 = vld [vmem:[%s2532_s11 + $0x48] sm:$0xff]  ;;  %v2244_v1 = vpack.c.bf16 %v226_v62, %v225_v61  ;;  %v227_v2 = vld [vmem:[%s3107_s1 + $0x50] sm:$0xff] }
  0x15   : > { %2211 = vmatpush3.bf16.msra.mxu0 %v2208_v12  ;;  %v228_v3 = vld [vmem:[%s3107_s1 + $0x58] sm:$0xff]  ;;  %v2667_v4 = vld [vmem:[%s2532_s11 + $0x50] sm:$0xff]  ;;  %v229_v7 = vld [vmem:[%s3107_s1 + $0x60] sm:$0xff] }
  0x16   : > { %2213 = vmatprep.subr.bf16.mxu0 %v2212_v15  ;;  %2303 = vmatpush3.bf16.msra.mxu1 %v2300_v35  ;;  %v2670_v5 = vld [vmem:[%s2532_s11 + $0x58] sm:$0xff]  ;;  %v2248_v6 = vpack.c.bf16 %v228_v3, %v227_v2  ;;  %v230_v8 = vld [vmem:[%s3107_s1 + $0x68] sm:$0xff]  ;;  %v2681_v9 = vld [vmem:[%s2532_s11 + $0x60] sm:$0xff] }
  0x17   : > { %2305 = vmatprep.subr.bf16.mxu1 %v2304_v41  ;;  %v2684_v10 = vld [vmem:[%s2532_s11 + $0x68] sm:$0xff]  ;;  %v2252_v12 = vpack.c.bf16 %v230_v8, %v229_v7  ;;  %v231_v13 = vld [vmem:[%s3107_s1 + $0x70] sm:$0xff]  ;;  %v232_v14 = vld [vmem:[%s3107_s1 + $0x78] sm:$0xff] }
  0x18   : > { %v2698_v16 = vld [vmem:[%s2532_s11 + $0x78] sm:$0xff]  ;;  %v2256_v17 = vpack.c.bf16 %v232_v14, %v231_v13  ;;  %v1599_v19 = vld [vmem:[%s3107_s1 + $0x108] sm:$0xff]  ;;  %v2709_v20 = vld [vmem:[%s2532_s11 + $0x80] sm:$0xff] }
  0x19   : > { %2215 = vmatpush3.bf16.msra.mxu0 %v2212_v15  ;;  %v2695_v15 = vld [vmem:[%s2532_s11 + $0x70] sm:$0xff]  ;;  %v1601_v24 = vld [vmem:[%s3107_s1 + $0x118] sm:$0xff]  ;;  %v1602_v26 = vld [vmem:[%s3107_s1 + $0x120] sm:$0xff] }
  0x1a   : > { %2217 = vmatprep.subr.bf16.mxu0 %v2216_v18  ;;  %2307 = vmatpush3.bf16.msra.mxu1 %v2304_v41  ;;  %v1600_v23 = vld [vmem:[%s3107_s1 + $0x110] sm:$0xff]  ;;  %v1603_v27 = vld [vmem:[%s3107_s1 + $0x128] sm:$0xff]  ;;  %v1605_v30 = vld [vmem:[%s3107_s1 + $0x138] sm:$0xff] }
  0x1b   : > { %2309 = vmatprep.subr.bf16.mxu1 %v2308_v49  ;;  %v2264_v25 = vpack.c.bf16 %v1601_v24, %v1600_v23  ;;  %v2268_v28 = vpack.c.bf16 %v1603_v27, %v1602_v26  ;;  %v1604_v29 = vld [vmem:[%s3107_s1 + $0x130] sm:$0xff]  ;;  %v1607_v33 = vld [vmem:[%s3107_s1 + $0x148] sm:$0xff]  ;;  %v1609_v36 = vld [vmem:[%s3107_s1 + $0x158] sm:$0xff] }
  0x1c   : > { %v2272_v31 = vpack.c.bf16 %v1605_v30, %v1604_v29  ;;  %v1608_v35 = vld [vmem:[%s3107_s1 + $0x150] sm:$0xff]  ;;  %v1611_v39 = vld [vmem:[%s3107_s1 + $0x168] sm:$0xff]  ;;  %v1613_v43 = vld [vmem:[%s3107_s1 + $0x178] sm:$0xff] }
  0x1d   : > { %2219 = vmatpush3.bf16.msra.mxu0 %v2216_v18  ;;  %v1598_v18 = vld [vmem:[%s3107_s1 + $0x100] sm:$0xff]  ;;  %v2280_v37 = vpack.c.bf16 %v1609_v36, %v1608_v35  ;;  %v1612_v41 = vld [vmem:[%s3107_s1 + $0x170] sm:$0xff]  ;;  %v1629_v48 = vld [vmem:[%s3108_s2 + $0xe8] sm:$0xff] }
  0x1e   : > { %2221 = vmatprep.subr.bf16.mxu0 %v2220_v21  ;;  %2311 = vmatpush3.bf16.msra.mxu1 %v2308_v49  ;;  %v2260_v22 = vpack.c.bf16 %v1599_v19, %v1598_v18  ;;  %v2288_v44 = vpack.c.bf16 %v1613_v43, %v1612_v41  ;;  %v1628_v47 = vld [vmem:[%s3108_s2 + $0xe0] sm:$0xff]  ;;  %v1630_v51 = vld [vmem:[%s3108_s2 + $0xf0] sm:$0xff]  ;;  %v1631_v52 = vld [vmem:[%s3108_s2 + $0xf8] sm:$0xff] }
  0x1f   : > { %2313 = vmatprep.subr.bf16.mxu1 %v2312_v57  ;;  %v2316_v49 = vpack.c.bf16 %v1629_v48, %v1628_v47  ;;  %v846_v55 = vld [vmem:[%s3108_s2] sm:$0xff]  ;;  %v847_v56 = vld [vmem:[%s3108_s2 + $0x8] sm:$0xff]  ;;  %v849_v13 = vld [vmem:[%s3108_s2 + $0x18] sm:$0xff] }
  0x20   : > { %v2812_v62 = vld [vmem:[%s3109_s3 + $0x1] ss:$0 sm:$0xff]  ;;  %v851_v27 = vld [vmem:[%s3108_s2 + $0x28] sm:$0xff] }
  0x21   : > { %2223 = vmatpush3.bf16.msra.mxu0 %v2220_v21  ;;  %v201_v21 = vld [vmem:[%s2532_s11] sm:$0xff] }
  0x22   : > { %2225 = vmatprep.subr.bf16.mxu0 %v2224_v32  ;;  %2315 = vmatpush3.bf16.msra.mxu1 %v2312_v57  ;;  %v2324_v57 = vpack.c.bf16 %v847_v56, %v846_v55  ;;  %v850_v26 = vld [vmem:[%s3108_s2 + $0x20] sm:$0xff] }
  0x23   : > { %2317 = vmatprep.subr.bf16.mxu1 %v2316_v49 }
  0x25   : > { %2227 = vmatpush3.bf16.msra.mxu0 %v2224_v32  ;;  %v1606_v32 = vld [vmem:[%s3107_s1 + $0x140] sm:$0xff] }
  0x26   : > { %2229 = vmatprep.subr.bf16.mxu0 %v2228_v38  ;;  %v2276_v34 = vpack.c.bf16 %v1607_v33, %v1606_v32  ;;  %2319 = vmatpush3.bf16.msra.mxu1 %v2316_v49 }
  0x28   : > { %1893 = vmatmul.mubr.f32.vlgmr.msra.gmra.mrb[0].mxu0 %v2599_v42 }
  0x29   : > { %2231 = vmatpush3.bf16.msra.mxu0 %v2228_v38  ;;  %1895 = vmatprep.mubr.f32.mxu0 %v2608_v45  ;;  %v1610_v38 = vld [vmem:[%s3107_s1 + $0x160] sm:$0xff] }
  0x2a   : > { %2233 = vmatprep.subr.bf16.mxu0 %v2232_v46  ;;  %v2284_v40 = vpack.c.bf16 %v1611_v39, %v1610_v38  ;;  %v853_v38 = vld [vmem:[%s3108_s2 + $0x38] sm:$0xff] }
  0x2c   : > { %1896 = vmatmul.mubr.f32.gmra.mrb[2].mxu0 %v2619_v50 }
  0x2d   : > { %2235 = vmatpush3.bf16.msra.mxu0 %v2232_v46  ;;  %1898 = vmatprep.mubr.f32.mxu0 %v2628_v53  ;;  %v1597_v46 = vld [vmem:[%s2532_s11 + $0x88] sm:$0xff] }
  0x2e   : > { %2237 = vmatprep.subr.bf16.mxu0 %v2236_v54 }
  0x30   : > { %1899 = vmatmul.mubr.f32.gmra.mrb[4].mxu0 %v2639_v58 }
  0x31   : > { %2239 = vmatpush3.bf16.msra.mxu0 %v2236_v54  ;;  %1901 = vmatprep.mubr.f32.mxu0 %v2642_v59  ;;  %v2320_v54 = vpack.c.bf16 %v1631_v52, %v1630_v51  ;;  %v854_v51 = vld [vmem:[%s3108_s2 + $0x40] sm:$0xff]  ;;  %v855_v52 = vld [vmem:[%s3108_s2 + $0x48] sm:$0xff] }
  0x32   : > { %2241 = vmatprep.subr.bf16.mxu0 %v2240_v60 }
  0x33   : > { %2321 = vmatprep.subr.bf16.mxu1 %v2320_v54 }
  0x34   : > { %1902 = vmatmul.mubr.f32.gmra.mrb[6].mxu0 %v2653_v63  ;;  %2323 = vmatpush3.bf16.msra.mxu1 %v2320_v54 }
  0x35   : > { %2243 = vmatpush3.bf16.msra.mxu0 %v2240_v60  ;;  %1904 = vmatprep.mubr.f32.mxu0 %v2656_v0  ;;  %v2807_v60 = vld [vmem:[%s3109_s3] ss:$0 sm:$0xff] }
  0x36   : > { %2245 = vmatprep.subr.bf16.mxu0 %v2244_v1  ;;  %2325 = vmatprep.subr.bf16.mxu1 %v2324_v57 }
  0x38   : > { %1905 = vmatmul.mubr.f32.gmra.mrb[8].mxu0 %v2667_v4 }
  0x39   : > { %2247 = vmatpush3.bf16.msra.mxu0 %v2244_v1  ;;  %1907 = vmatprep.mubr.f32.mxu0 %v2670_v5 }
  0x3a   : > { %2249 = vmatprep.subr.bf16.mxu0 %v2248_v6 }
  0x3c   : > { %1908 = vmatmul.mubr.f32.gmra.mrb[10].mxu0 %v2681_v9 }
  0x3d   : > { %2251 = vmatpush3.bf16.msra.mxu0 %v2248_v6  ;;  %1910 = vmatprep.mubr.f32.mxu0 %v2684_v10 }
  0x3e   : > { %2253 = vmatprep.subr.bf16.mxu0 %v2252_v12 }
  0x40   : > { %1911 = vmatmul.mubr.f32.gmra.mrb[12].mxu0 %v2695_v15 }
  0x41   : > { %2255 = vmatpush3.bf16.msra.mxu0 %v2252_v12  ;;  %1913 = vmatprep.mubr.f32.mxu0 %v2698_v16  ;;  %v848_v12 = vld [vmem:[%s3108_s2 + $0x10] sm:$0xff] }
  0x42   : > { %2257 = vmatprep.subr.bf16.mxu0 %v2256_v17  ;;  %v2328_v23 = vpack.c.bf16 %v849_v13, %v848_v12  ;;  %v857_v12 = vld [vmem:[%s3108_s2 + $0x58] sm:$0xff] }
  0x44   : > { %1914 = vmatmul.mubr.f32.gmra.mrb[14].mxu0 %v2709_v20 }
  0x45   : > { %2259 = vmatpush3.bf16.msra.mxu0 %v2256_v17  ;;  %1948 = vmatprep.mubr.f32.mxu0 %v201_v21 }
  0x46   : > { %2261 = vmatprep.subr.bf16.mxu0 %v2260_v22 }
  0x48   : > { %1949 = vmatmul.mubr.f32.vlgmr.msra.gmra.mrb[0].mxu0 %v2535_v11 }
  0x49   : > { %2263 = vmatpush3.bf16.msra.mxu0 %v2260_v22  ;;  %1951 = vmatprep.mubr.f32.mxu0 %v2599_v42 }
  0x4a   : > { %2265 = vmatprep.subr.bf16.mxu0 %v2264_v25 }
  0x4c   : > { %1952 = vmatmul.mubr.f32.gmra.mrb[2].mxu0 %v2608_v45 }
  0x4d   : > { %2267 = vmatpush3.bf16.msra.mxu0 %v2264_v25  ;;  %1954 = vmatprep.mubr.f32.mxu0 %v2619_v50 }
  0x4e   : > { %2269 = vmatprep.subr.bf16.mxu0 %v2268_v28 }
  0x50   : > { %1955 = vmatmul.mubr.f32.gmra.mrb[4].mxu0 %v2628_v53 }
  0x51   : > { %2271 = vmatpush3.bf16.msra.mxu0 %v2268_v28  ;;  %1957 = vmatprep.mubr.f32.mxu0 %v2639_v58 }
  0x52   : > { %2273 = vmatprep.subr.bf16.mxu0 %v2272_v31 }
  0x54   : > { %1958 = vmatmul.mubr.f32.gmra.mrb[6].mxu0 %v2642_v59 }
  0x55   : > { %2275 = vmatpush3.bf16.msra.mxu0 %v2272_v31  ;;  %1960 = vmatprep.mubr.f32.mxu0 %v2653_v63 }
  0x56   : > { %2277 = vmatprep.subr.bf16.mxu0 %v2276_v34 }
  0x58   : > { %1961 = vmatmul.mubr.f32.gmra.mrb[8].mxu0 %v2656_v0 }
  0x59   : > { %2279 = vmatpush3.bf16.msra.mxu0 %v2276_v34  ;;  %1963 = vmatprep.mubr.f32.mxu0 %v2667_v4  ;;  %v2332_v34 = vpack.c.bf16 %v851_v27, %v850_v26  ;;  %v858_v27 = vld [vmem:[%s3108_s2 + $0x60] sm:$0xff] }
  0x5a   : > { %2281 = vmatprep.subr.bf16.mxu0 %v2280_v37 }
  0x5c   : > { %1964 = vmatmul.mubr.f32.gmra.mrb[10].mxu0 %v2670_v5 }
  0x5d   : > { %2283 = vmatpush3.bf16.msra.mxu0 %v2280_v37  ;;  %1966 = vmatprep.mubr.f32.mxu0 %v2681_v9  ;;  %v852_v37 = vld [vmem:[%s3108_s2 + $0x30] sm:$0xff] }
  0x5e   : > { %2285 = vmatprep.subr.bf16.mxu0 %v2284_v40  ;;  %v2336_v47 = vpack.c.bf16 %v853_v38, %v852_v37 }
  0x60   : > { %1967 = vmatmul.mubr.f32.gmra.mrb[12].mxu0 %v2684_v10 }
  0x61   : > { %2287 = vmatpush3.bf16.msra.mxu0 %v2284_v40  ;;  %1969 = vmatprep.mubr.f32.mxu0 %v2695_v15 }
  0x62   : > { %2289 = vmatprep.subr.bf16.mxu0 %v2288_v44 }
  0x64   : > { %1970 = vmatmul.mubr.f32.gmra.mrb[14].mxu0 %v2698_v16 }
  0x65   : > { %2291 = vmatpush3.bf16.msra.mxu0 %v2288_v44  ;;  %2004 = vmatprep.mubr.f32.mxu0 %v2599_v42 }
  0x68   : > { %2005 = vmatmul.mubr.f32.vlgmr.msra.gmra.mrb[0].mxu0 %v2608_v45 }
  0x69   : > { %2007 = vmatprep.mubr.f32.mxu0 %v2619_v50 }
  0x6c   : > { %2008 = vmatmul.mubr.f32.gmra.mrb[2].mxu0 %v2628_v53 }
  0x6d   : > { %2010 = vmatprep.mubr.f32.mxu0 %v2639_v58 }
  0x70   : > { %2011 = vmatmul.mubr.f32.gmra.mrb[4].mxu0 %v2642_v59 }
  0x71   : > { %2013 = vmatprep.mubr.f32.mxu0 %v2653_v63 }
  0x74   : > { %2014 = vmatmul.mubr.f32.gmra.mrb[6].mxu0 %v2656_v0 }
  0x75   : > { %2016 = vmatprep.mubr.f32.mxu0 %v2667_v4 }
  0x78   : > { %2017 = vmatmul.mubr.f32.gmra.mrb[8].mxu0 %v2670_v5 }
  0x79   : > { %2019 = vmatprep.mubr.f32.mxu0 %v2681_v9 }
  0x7c   : > { %2020 = vmatmul.mubr.f32.gmra.mrb[10].mxu0 %v2684_v10 }
  0x7d   : > { %2022 = vmatprep.mubr.f32.mxu0 %v2695_v15 }
  0x80   : > { %2023 = vmatmul.mubr.f32.gmra.mrb[12].mxu0 %v2698_v16 }
  0x81   : > { %2025 = vmatprep.mubr.f32.mxu0 %v2709_v20 }
  0x84   : > { %2026 = vmatmul.mubr.f32.gmra.mrb[14].mxu0 %v1597_v46 }
 0x13b   : > { %v2006_v61 = vpop.f32.mrb[0].mxu0 }
 0x13c   : > { %v758_v1 = vmul.f32 %v2006_v61, %v2807_v60  ;;  %v657_v2 = vpop.f32.mrb[1].mxu0 }
 0x13d   : > { %v757_v3 = vmul.f32 %v2807_v60, %v657_v2  ;;  %v2340_v2 = vpack.c.bf16 %v855_v52, %v854_v51 }
 0x13e   : > { %v779_v6 = vadd.f32 %v2812_v62, %v758_v1 }
 0x13f   : > { %v2009_v7 = vpop.f32.mrb[2].mxu0  ;;  %v2818_v8 = vadd.f32 %v2812_v62, %v757_v3 }
 0x140   : > { %v760_v14 = vmul.f32 %v2009_v7, %v2807_v60  ;;  %v667_v17 = vpop.f32.mrb[3].mxu0  ;;  %v2829_v21 = vmax.f32 %v779_v6, 0.0  ;;  %v856_v7 = vld [vmem:[%s3108_s2 + $0x50] sm:$0xff] }
 0x141   : > { %v759_v18 = vmul.f32 %v2807_v60, %v667_v17  ;;  %v794_v19 = vmax.f32 %v2818_v8, 0.0 }
 0x142   : > { %v781_v22 = vadd.f32 %v2812_v62, %v760_v14 }
 0x143   : > { %v780_v24 = vadd.f32 %v2812_v62, %v759_v18  ;;  %v2012_v25 = vpop.f32.mrb[4].mxu0  ;;  %2060 = vmatprep.mubr.f32.mxu1 %v794_v19 }
 0x144   : > { %v762_v28 = vmul.f32 %v2012_v25, %v2807_v60  ;;  %v677_v29 = vpop.f32.mrb[5].mxu0  ;;  %2061 = vmatmul.mubr.f32.vlgmr.msra.gmra.mrb[0].mxu1 %v2829_v21  ;;  %v2846_v32 = vmax.f32 %v781_v22, 0.0 }
 0x145   : > { %v2843_v30 = vmax.f32 %v780_v24, 0.0  ;;  %v761_v31 = vmul.f32 %v2807_v60, %v677_v29  ;;  %2327 = vmatpush3.bf16.msra.mxu1 %v2324_v57  ;;  %v2344_v24 = vpack.c.bf16 %v857_v12, %v856_v7  ;;  %v2469_v7 = vmov 0.0  }
 0x146   : > { %v783_v33 = vadd.f32 %v2812_v62, %v762_v28  ;;  %2329 = vmatprep.subr.bf16.mxu1 %v2328_v23  ;;  %v859_v28 = vld [vmem:[%s3108_s2 + $0x68] sm:$0xff] }
 0x147   : > { %v782_v35 = vadd.f32 %v2812_v62, %v761_v31  ;;  %v2015_v36 = vpop.f32.mrb[6].mxu0  ;;  %2063 = vmatprep.mubr.f32.mxu1 %v2843_v30  ;;  %v2348_v37 = vpack.c.bf16 %v859_v28, %v858_v27  ;;  %v1642_v27 = vld [vmem:[%s3108_s2 + $0x150] sm:$0xff]  ;;  %v1643_v28 = vld [vmem:[%s3108_s2 + $0x158] sm:$0xff] }
 0x148   : > { %v764_v39 = vmul.f32 %v2015_v36, %v2807_v60  ;;  %v687_v40 = vpop.f32.mrb[7].mxu0  ;;  %2064 = vmatmul.mubr.f32.gmra.mrb[2].mxu1 %v2846_v32  ;;  %v2862_v44 = vmax.f32 %v783_v33, 0.0 }
 0x149   : > { %v2859_v41 = vmax.f32 %v782_v35, 0.0  ;;  %v763_v43 = vmul.f32 %v2807_v60, %v687_v40  ;;  %2331 = vmatpush3.bf16.msra.mxu1 %v2328_v23  ;;  %v860_v40 = vld [vmem:[%s3108_s2 + $0x70] sm:$0xff] }
 0x14a   : > { %v785_v46 = vadd.f32 %v2812_v62, %v764_v39  ;;  %2333 = vmatprep.subr.bf16.mxu1 %v2332_v34 }
 0x14b   : > { %v784_v48 = vadd.f32 %v2812_v62, %v763_v43  ;;  %v2018_v49 = vpop.f32.mrb[8].mxu0  ;;  %2066 = vmatprep.mubr.f32.mxu1 %v2859_v41  ;;  %v861_v43 = vld [vmem:[%s3108_s2 + $0x78] sm:$0xff] }
 0x14c   : > { %v766_v54 = vmul.f32 %v2018_v49, %v2807_v60  ;;  %v697_v55 = vpop.f32.mrb[9].mxu0  ;;  %2067 = vmatmul.mubr.f32.gmra.mrb[4].mxu1 %v2862_v44  ;;  %v2878_v61 = vmax.f32 %v785_v46, 0.0 }
 0x14d   : > { %v2875_v56 = vmax.f32 %v784_v48, 0.0  ;;  %v765_v57 = vmul.f32 %v2807_v60, %v697_v55  ;;  %2335 = vmatpush3.bf16.msra.mxu1 %v2332_v34 }
 0x14e   : > { %v787_v1 = vadd.f32 %v2812_v62, %v766_v54  ;;  %2337 = vmatprep.subr.bf16.mxu1 %v2336_v47  ;;  %v2352_v54 = vpack.c.bf16 %v861_v43, %v860_v40 }
 0x14f   : > { %v786_v3 = vadd.f32 %v2812_v62, %v765_v57  ;;  %v2021_v6 = vpop.f32.mrb[10].mxu0  ;;  %2069 = vmatprep.mubr.f32.mxu1 %v2875_v56  ;;  %v1632_v57 = vld [vmem:[%s3108_s2 + $0x100] sm:$0xff] }
 0x150   : > { %v768_v13 = vmul.f32 %v2021_v6, %v2807_v60  ;;  %v707_v14 = vpop.f32.mrb[11].mxu0  ;;  %2070 = vmatmul.mubr.f32.gmra.mrb[6].mxu1 %v2878_v61  ;;  %v2894_v22 = vmax.f32 %v787_v1, 0.0  ;;  %v1635_v6 = vld [vmem:[%s3108_s2 + $0x118] sm:$0xff] }
 0x151   : > { %v2891_v17 = vmax.f32 %v786_v3, 0.0  ;;  %v767_v18 = vmul.f32 %v2807_v60, %v707_v14  ;;  %2339 = vmatpush3.bf16.msra.mxu1 %v2336_v47  ;;  %v1637_v14 = vld [vmem:[%s3108_s2 + $0x128] sm:$0xff] }
 0x152   : > { %v789_v23 = vadd.f32 %v2812_v62, %v768_v13  ;;  %2341 = vmatprep.subr.bf16.mxu1 %v2340_v2  ;;  %v1636_v13 = vld [vmem:[%s3108_s2 + $0x120] sm:$0xff] }
 0x153   : > { %v788_v25 = vadd.f32 %v2812_v62, %v767_v18  ;;  %v2024_v26 = vpop.f32.mrb[12].mxu0  ;;  %2072 = vmatprep.mubr.f32.mxu1 %v2891_v17  ;;  %v2364_v18 = vpack.c.bf16 %v1637_v14, %v1636_v13 }
 0x154   : > { %v770_v29 = vmul.f32 %v2024_v26, %v2807_v60  ;;  %v717_v31 = vpop.f32.mrb[13].mxu0  ;;  %2073 = vmatmul.mubr.f32.gmra.mrb[8].mxu1 %v2894_v22  ;;  %v2910_v35 = vmax.f32 %v789_v23, 0.0  ;;  %v1638_v23 = vld [vmem:[%s3108_s2 + $0x130] sm:$0xff] }
 0x155   : > { %v2907_v33 = vmax.f32 %v788_v25, 0.0  ;;  %v769_v34 = vmul.f32 %v2807_v60, %v717_v31  ;;  %2343 = vmatpush3.bf16.msra.mxu1 %v2340_v2  ;;  %v1641_v25 = vld [vmem:[%s3108_s2 + $0x148] sm:$0xff]  ;;  %v1644_v31 = vld [vmem:[%s3108_s2 + $0x160] sm:$0xff] }
 0x156   : > { %v791_v36 = vadd.f32 %v2812_v62, %v770_v29  ;;  %2345 = vmatprep.subr.bf16.mxu1 %v2344_v24  ;;  %v2376_v29 = vpack.c.bf16 %v1643_v28, %v1642_v27 }
 0x157   : > { %v790_v38 = vadd.f32 %v2812_v62, %v769_v34  ;;  %v2027_v39 = vpop.f32.mrb[14].mxu0  ;;  %2075 = vmatprep.mubr.f32.mxu1 %v2907_v33  ;;  %v1645_v34 = vld [vmem:[%s3108_s2 + $0x168] sm:$0xff] }
 0x158   : > { %v772_v46 = vmul.f32 %v2027_v39, %v2807_v60  ;;  %v727_v47 = vpop.f32.mrb[15].mxu0  ;;  %2076 = vmatmul.mubr.f32.gmra.mrb[10].mxu1 %v2910_v35  ;;  %v2926_v51 = vmax.f32 %v791_v36, 0.0  ;;  %v2380_v36 = vpack.c.bf16 %v1645_v34, %v1644_v31 }
 0x159   : > { %v2923_v48 = vmax.f32 %v790_v38, 0.0  ;;  %v771_v49 = vmul.f32 %v2807_v60, %v727_v47  ;;  %2347 = vmatpush3.bf16.msra.mxu1 %v2344_v24  ;;  %v1633_v60 = vld [vmem:[%s3108_s2 + $0x108] sm:$0xff]  ;;  %v1639_v24 = vld [vmem:[%s3108_s2 + $0x138] sm:$0xff] }
 0x15a   : > { %v2929_v52 = vadd.f32 %v2812_v62, %v772_v46  ;;  %2349 = vmatprep.subr.bf16.mxu1 %v2348_v37  ;;  %v2356_v3 = vpack.c.bf16 %v1633_v60, %v1632_v57  ;;  %v2368_v8 = vpack.c.bf16 %v1639_v24, %v1638_v23  ;;  %v1647_v38 = vld [vmem:[%s3108_s2 + $0x178] sm:$0xff] }
 0x15b   : > { %v792_v55 = vadd.f32 %v2812_v62, %v771_v49  ;;  %2078 = vmatprep.mubr.f32.mxu1 %v2923_v48  ;;  %v1634_v62 = vld [vmem:[%s3108_s2 + $0x110] sm:$0xff] }
 0x15c   : > { %2079 = vmatmul.mubr.f32.gmra.mrb[12].mxu1 %v2926_v51  ;;  %v809_v2 = vmax.f32 %v2929_v52, 0.0  ;;  %v2360_v12 = vpack.c.bf16 %v1635_v6, %v1634_v62 }
 0x15d   : > { %v2940_v1 = vmax.f32 %v792_v55, 0.0  ;;  %2351 = vmatpush3.bf16.msra.mxu1 %v2348_v37  ;;  %v1646_v37 = vld [vmem:[%s3108_s2 + $0x170] sm:$0xff] }
 0x15e   : > { %2353 = vmatprep.subr.bf16.mxu1 %v2352_v54  ;;  %v2384_v39 = vpack.c.bf16 %v1647_v38, %v1646_v37 }
 0x15f   : > { %2081 = vmatprep.mubr.f32.mxu1 %v2940_v1 }
 0x160   : > { %2082 = vmatmul.mubr.f32.gmra.mrb[14].mxu1 %v809_v2 }
 0x161   : > { %2355 = vmatpush3.bf16.msra.mxu1 %v2352_v54  ;;  %2116 = vmatprep.mubr.f32.mxu1 %v2469_v7 }
 0x162   : > { %2357 = vmatprep.subr.bf16.mxu1 %v2356_v3 }
 0x164   : > { %2117 = vmatmul.mubr.f32.vlgmr.msra.gmra.mrb[0].mxu1 %v794_v19  ;;  %v1640_v19 = vld [vmem:[%s3108_s2 + $0x140] sm:$0xff] }
 0x165   : > { %2119 = vmatprep.mubr.f32.mxu1 %v2829_v21  ;;  %2359 = vmatpush3.bf16.msra.mxu1 %v2356_v3  ;;  %v2372_v26 = vpack.c.bf16 %v1641_v25, %v1640_v19 }
 0x166   : > { %2361 = vmatprep.subr.bf16.mxu1 %v2360_v12 }
 0x168   : > { %2120 = vmatmul.mubr.f32.gmra.mrb[2].mxu1 %v2843_v30 }
 0x169   : > { %2122 = vmatprep.mubr.f32.mxu1 %v2846_v32  ;;  %2363 = vmatpush3.bf16.msra.mxu1 %v2360_v12 }
 0x16a   : > { %2365 = vmatprep.subr.bf16.mxu1 %v2364_v18 }
 0x16c   : > { %2123 = vmatmul.mubr.f32.gmra.mrb[4].mxu1 %v2859_v41 }
 0x16d   : > { %2125 = vmatprep.mubr.f32.mxu1 %v2862_v44  ;;  %2367 = vmatpush3.bf16.msra.mxu1 %v2364_v18 }
 0x16e   : > { %2369 = vmatprep.subr.bf16.mxu1 %v2368_v8 }
 0x170   : > { %2126 = vmatmul.mubr.f32.gmra.mrb[6].mxu1 %v2875_v56 }
 0x171   : > { %2128 = vmatprep.mubr.f32.mxu1 %v2878_v61  ;;  %2371 = vmatpush3.bf16.msra.mxu1 %v2368_v8 }
 0x172   : > { %2373 = vmatprep.subr.bf16.mxu1 %v2372_v26 }
 0x174   : > { %2129 = vmatmul.mubr.f32.gmra.mrb[8].mxu1 %v2891_v17 }
 0x175   : > { %2131 = vmatprep.mubr.f32.mxu1 %v2894_v22  ;;  %2375 = vmatpush3.bf16.msra.mxu1 %v2372_v26 }
 0x176   : > { %2377 = vmatprep.subr.bf16.mxu1 %v2376_v29 }
 0x178   : > { %2132 = vmatmul.mubr.f32.gmra.mrb[10].mxu1 %v2907_v33 }
 0x179   : > { %2134 = vmatprep.mubr.f32.mxu1 %v2910_v35  ;;  %2379 = vmatpush3.bf16.msra.mxu1 %v2376_v29 }
 0x17a   : > { %2381 = vmatprep.subr.bf16.mxu1 %v2380_v36 }
 0x17c   : > { %2135 = vmatmul.mubr.f32.gmra.mrb[12].mxu1 %v2923_v48 }
 0x17d   : > { %2137 = vmatprep.mubr.f32.mxu1 %v2926_v51  ;;  %2383 = vmatpush3.bf16.msra.mxu1 %v2380_v36 }
 0x17e   : > { %2385 = vmatprep.subr.bf16.mxu1 %v2384_v39 }
 0x180   : > { %2138 = vmatmul.mubr.f32.gmra.mrb[14].mxu1 %v2940_v1 }
 0x181   : > { %2387 = vmatpush3.bf16.msra.mxu1 %v2384_v39  ;;  %2172 = vmatprep.mubr.f32.mxu1 %v2829_v21  ;;  %v3027_v21 = vld [vmem:[%s3109_s3 + $0x2] ss:$0 sm:$0xff] }
 0x184   : > { %2173 = vmatmul.mubr.f32.vlgmr.msra.gmra.mrb[0].mxu1 %v2843_v30 }
 0x185   : > { %2175 = vmatprep.mubr.f32.mxu1 %v2846_v32  ;;  %v3032_v32 = vld [vmem:[%s3109_s3 + $0x3] ss:$0 sm:$0xff] }
 0x188   : > { %2176 = vmatmul.mubr.f32.gmra.mrb[2].mxu1 %v2859_v41 }
 0x189   : > { %2178 = vmatprep.mubr.f32.mxu1 %v2862_v44 }
 0x18c   : > { %2179 = vmatmul.mubr.f32.gmra.mrb[4].mxu1 %v2875_v56 }
 0x18d   : > { %2181 = vmatprep.mubr.f32.mxu1 %v2878_v61 }
 0x190   : > { %2182 = vmatmul.mubr.f32.gmra.mrb[6].mxu1 %v2891_v17 }
 0x191   : > { %2184 = vmatprep.mubr.f32.mxu1 %v2894_v22 }
 0x194   : > { %2185 = vmatmul.mubr.f32.gmra.mrb[8].mxu1 %v2907_v33 }
 0x195   : > { %2187 = vmatprep.mubr.f32.mxu1 %v2910_v35 }
 0x198   : > { %2188 = vmatmul.mubr.f32.gmra.mrb[10].mxu1 %v2923_v48 }
 0x199   : > { %2190 = vmatprep.mubr.f32.mxu1 %v2926_v51 }
 0x19c   : > { %2191 = vmatmul.mubr.f32.gmra.mrb[12].mxu1 %v2940_v1 }
 0x19d   : > { %2193 = vmatprep.mubr.f32.mxu1 %v809_v2 }
 0x1a0   : > { %2194 = vmatmul.mubr.f32.gmra.mrb[14].mxu1 %v2469_v7 }
 0x257   : > { %v2174_v30 = vpop.f32.mrb[0].mxu1 }
 0x258   : > { %v1402_v41 = vmul.f32 %v2174_v30, %v3027_v21  ;;  %v1285_v44 = vpop.f32.mrb[1].mxu1 }
 0x259   : > { %v1401_v56 = vmul.f32 %v3027_v21, %v1285_v44 }
 0x25a   : > { %v1423_v61 = vadd.f32 %v3032_v32, %v1402_v41 }
 0x25b   : > { %v1422_v17 = vadd.f32 %v3032_v32, %v1401_v56  ;;  %v2177_v22 = vpop.f32.mrb[2].mxu1 }
 0x25c   : > { %v1439_v33 = vadd.f32 %v2599_v42, %v1423_v61  ;;  %v1404_v35 = vmul.f32 %v2177_v22, %v3027_v21  ;;  %v1295_v40 = vpop.f32.mrb[3].mxu1 }
 0x25d   : > { %v1438_v43 = vadd.f32 %v2535_v11, %v1422_v17  ;;  %v1403_v46 = vmul.f32 %v3027_v21, %v1295_v40 }
 0x25e   : > { %v1455_v47 = vmax.f32 %v1439_v33, 0.0  ;;  %v1425_v48 = vadd.f32 %v3032_v32, %v1404_v35 }
 0x25f   : > { %v1454_v49 = vmax.f32 %v1438_v43, 0.0  ;;  %v1424_v42 = vadd.f32 %v3032_v32, %v1403_v46  ;;  %v2180_v51 = vpop.f32.mrb[4].mxu1 }
 0x260   : > { %1471 = vst [vmem:[%s3043_s10 + $0x8] sm:$0xff] %v1455_v47  ;;  %v1441_v52 = vadd.f32 %v2619_v50, %v1425_v48  ;;  %v1406_v54 = vmul.f32 %v2180_v51, %v3027_v21  ;;  %v1305_v55 = vpop.f32.mrb[5].mxu1 }
 0x261   : > { %1470 = vst [vmem:[%s3043_s10] sm:$0xff] %v1454_v49  ;;  %v1440_v11 = vadd.f32 %v2608_v45, %v1424_v42  ;;  %v1405_v57 = vmul.f32 %v3027_v21, %v1305_v55 }
 0x262   : > { %v1457_v60 = vmax.f32 %v1441_v52, 0.0  ;;  %v1427_v1 = vadd.f32 %v3032_v32, %v1406_v54 }
 0x263   : > { %v1456_v2 = vmax.f32 %v1440_v11, 0.0  ;;  %v1426_v3 = vadd.f32 %v3032_v32, %v1405_v57  ;;  %v2183_v62 = vpop.f32.mrb[6].mxu1 }
 0x264   : > { %1473 = vst [vmem:[%s3043_s10 + $0x18] sm:$0xff] %v1457_v60  ;;  %v1443_v50 = vadd.f32 %v2639_v58, %v1427_v1  ;;  %v1408_v6 = vmul.f32 %v2183_v62, %v3027_v21  ;;  %v1315_v7 = vpop.f32.mrb[7].mxu1 }
 0x265   : > { %1472 = vst [vmem:[%s3043_s10 + $0x10] sm:$0xff] %v1456_v2  ;;  %v1442_v45 = vadd.f32 %v2628_v53, %v1426_v3  ;;  %v1407_v12 = vmul.f32 %v3027_v21, %v1315_v7 }
 0x266   : > { %v1459_v13 = vmax.f32 %v1443_v50, 0.0  ;;  %v1429_v14 = vadd.f32 %v3032_v32, %v1408_v6 }
 0x267   : > { %v1458_v18 = vmax.f32 %v1442_v45, 0.0  ;;  %v1428_v23 = vadd.f32 %v3032_v32, %v1407_v12  ;;  %v2186_v24 = vpop.f32.mrb[8].mxu1 }
 0x268   : > { %1475 = vst [vmem:[%s3043_s10 + $0x28] sm:$0xff] %v1459_v13  ;;  %v1445_v58 = vadd.f32 %v2653_v63, %v1429_v14  ;;  %v1410_v8 = vmul.f32 %v2186_v24, %v3027_v21  ;;  %v1325_v19 = vpop.f32.mrb[9].mxu1 }
 0x269   : > { %1474 = vst [vmem:[%s3043_s10 + $0x20] sm:$0xff] %v1458_v18  ;;  %v1444_v53 = vadd.f32 %v2642_v59, %v1428_v23  ;;  %v1409_v25 = vmul.f32 %v3027_v21, %v1325_v19 }
 0x26a   : > { %v1461_v26 = vmax.f32 %v1445_v58, 0.0  ;;  %v1431_v27 = vadd.f32 %v3032_v32, %v1410_v8 }
 0x26b   : > { %v1460_v28 = vmax.f32 %v1444_v53, 0.0  ;;  %v1430_v29 = vadd.f32 %v3032_v32, %v1409_v25  ;;  %v2189_v31 = vpop.f32.mrb[10].mxu1 }
 0x26c   : > { %1477 = vst [vmem:[%s3043_s10 + $0x38] sm:$0xff] %v1461_v26  ;;  %v1447_v63 = vadd.f32 %v2667_v4, %v1431_v27  ;;  %v1412_v34 = vmul.f32 %v2189_v31, %v3027_v21  ;;  %v1335_v36 = vpop.f32.mrb[11].mxu1 }
 0x26d   : > { %1476 = vst [vmem:[%s3043_s10 + $0x30] sm:$0xff] %v1460_v28  ;;  %v1446_v59 = vadd.f32 %v2656_v0, %v1430_v29  ;;  %v1411_v37 = vmul.f32 %v3027_v21, %v1335_v36 }
 0x26e   : > { %v1463_v38 = vmax.f32 %v1447_v63, 0.0  ;;  %v1433_v39 = vadd.f32 %v3032_v32, %v1412_v34 }
 0x26f   : > { %v1462_v30 = vmax.f32 %v1446_v59, 0.0  ;;  %v1432_v41 = vadd.f32 %v3032_v32, %v1411_v37  ;;  %v2192_v44 = vpop.f32.mrb[12].mxu1 }
 0x270   : > { %1479 = vst [vmem:[%s3043_s10 + $0x48] sm:$0xff] %v1463_v38  ;;  %v1449_v4 = vadd.f32 %v2681_v9, %v1433_v39  ;;  %v1414_v56 = vmul.f32 %v2192_v44, %v3027_v21  ;;  %v1345_v61 = vpop.f32.mrb[13].mxu1 }
 0x271   : > { %1478 = vst [vmem:[%s3043_s10 + $0x40] sm:$0xff] %v1462_v30  ;;  %v1448_v0 = vadd.f32 %v2670_v5, %v1432_v41  ;;  %v1413_v17 = vmul.f32 %v3027_v21, %v1345_v61 }
 0x272   : > { %v1465_v22 = vmax.f32 %v1449_v4, 0.0  ;;  %v1435_v33 = vadd.f32 %v3032_v32, %v1414_v56 }
 0x273   : > { %v1464_v35 = vmax.f32 %v1448_v0, 0.0  ;;  %v1434_v40 = vadd.f32 %v3032_v32, %v1413_v17  ;;  %v2195_v43 = vpop.f32.mrb[14].mxu1 }
 0x274   : > { %1481 = vst [vmem:[%s3043_s10 + $0x58] sm:$0xff] %v1465_v22  ;;  %v1451_v9 = vadd.f32 %v2695_v15, %v1435_v33  ;;  %v1416_v46 = vmul.f32 %v2195_v43, %v3027_v21  ;;  %v1355_v47 = vpop.f32.mrb[15].mxu1 }
 0x275   : > { %1480 = vst [vmem:[%s3043_s10 + $0x50] sm:$0xff] %v1464_v35  ;;  %v1450_v5 = vadd.f32 %v2684_v10, %v1434_v40  ;;  %v1415_v48 = vmul.f32 %v3027_v21, %v1355_v47 }
 0x276   : > { %v1467_v49 = vmax.f32 %v1451_v9, 0.0  ;;  %v1437_v42 = vadd.f32 %v3032_v32, %v1416_v46 }
 0x277   : > { %v1466_v51 = vmax.f32 %v1450_v5, 0.0  ;;  %v1436_v52 = vadd.f32 %v3032_v32, %v1415_v48 }
 0x278   : > { %1483 = vst [vmem:[%s3043_s10 + $0x68] sm:$0xff] %v1467_v49  ;;  %v1453_v54 = vadd.f32 %v2709_v20, %v1437_v42 }
 0x279   : > { %1482 = vst [vmem:[%s3043_s10 + $0x60] sm:$0xff] %v1466_v51  ;;  %v1452_v15 = vadd.f32 %v2698_v16, %v1436_v52 }
 0x27a   : > { %v1469_v55 = vmax.f32 %v1453_v54, 0.0 }
 0x27b   : > { %v1468_v11 = vmax.f32 %v1452_v15, 0.0 }
 0x27c   : > { %1485 = vst [vmem:[%s3043_s10 + $0x78] sm:$0xff] %v1469_v55 }
 0x27d   : > { %1484 = vst [vmem:[%s3043_s10 + $0x70] sm:$0xff] %v1468_v11 }
 0x27e PF: > { %s14_s15 = sadd.s32 1, %s2467_s15  }
 0x27f   : > { %p11_p5 = scmp.ge.s32.totalorder %s14_s15, 4  }
 0x281   :  { %13 = sbr.rel (!%p11_p5) target bundleno = 1 (0x1), region = 75 }

</bundles_post_ra>
